<compile_context>
chip_gen: v5e
topology: v5e:2x2
jax: 0.10.0
libtpu: 0.0.40
codegen_flags: <defaults>
</compile_context>

<pallas_src>
import functools
import math

import jax
import jax.numpy as jnp
from jax.experimental import pallas as pl
from jax.experimental.pallas import tpu as pltpu


# ----------------------------------------------------------------------------
# Parameter construction (deterministic, mirrors PINN_Cos_nD.__init__ / xavier)
# ----------------------------------------------------------------------------
def init_pinn_params(key, n_hidden_layers, neurons):
    """Builds [(W, b), ...] in torch layout: W (out, in), b (out,)."""
    gain = 5.0 / 3.0  # nn.init.calculate_gain('tanh')
    dims = [1] + list(neurons) + [1]
    params = []
    for i in range(len(dims) - 1):
        key, sub = jax.random.split(key)
        fan_in, fan_out = dims[i], dims[i + 1]
        limit = gain * math.sqrt(6.0 / (fan_in + fan_out))
        w = jax.random.uniform(
            sub, (fan_out, fan_in), dtype=jnp.float32, minval=-limit, maxval=limit
        )
        b = jnp.zeros((fan_out,), dtype=jnp.float32)  # bias filled with 0
        params.append((w, b))
    return params


# ----------------------------------------------------------------------------
# Pallas kernel: full MLP forward on one lane-major batch tile
# ----------------------------------------------------------------------------
def mlp_kernel(n_hidden_matmuls, *refs):
    # refs = (x_ref, w0, b0, [w_h, b_h] * n_hidden_matmuls, w_out, b_out, o_ref)
    x_ref = refs[0]
    o_ref = refs[-1]
    wb = refs[1:-1]

    x = x_ref[...]                      # (1, tm)   batch on lanes
    w0 = wb[0][...]                     # (n0, 1)   f32
    b0 = wb[1][...]                     # (n0, 1)   f32
    # Rank-1 input layer: outer product via VPU broadcast, no MXU push.
    h = jnp.tanh(w0 * x + b0)           # (n0, tm)  f32

    # Real hidden matmuls on the MXU: (n_out, n_in) @ (n_in, tm), f32 accumulate.
    # If the hidden weights were passed in bf16, h is cast to match (bf16 MXU
    # operands, f32 accumulation); bias-add and tanh stay f32 (safe on v5e).
    for l in range(n_hidden_matmuls):
        w = wb[2 + 2 * l][...]          # (n_out, n_in)  f32 or bf16
        b = wb[3 + 2 * l][...]          # (n_out, 1)     f32
        z = jnp.dot(w, h.astype(w.dtype), preferred_element_type=jnp.float32)
        h = jnp.tanh(z + b)

    # Rank-1 output layer: elementwise multiply + sublane (XLU) reduction.
    w_out = wb[-2][...]                 # (n_last, 1) f32
    b_out = wb[-1][...]                 # (1, 1)      f32
    y = jnp.sum(w_out * h, axis=0, keepdims=True) + b_out   # (1, tm)
    o_ref[...] = y.astype(o_ref.dtype)


# ----------------------------------------------------------------------------
# Tiling plan
# ----------------------------------------------------------------------------
def _round_up(v, m):
    return ((v + m - 1) // m) * m


def _tensorcores_per_chip():
    """Best-effort TensorCore count per chip (v4/v5p/v7x: 2; v5e/v6e: 1)."""
    try:
        info = pltpu.get_tpu_info()
        for attr in ("num_cores", "core_count", "num_tensorcores",
                     "tensorcore_count", "cores_per_chip"):
            v = getattr(info, attr, None)
            if isinstance(v, int) and 1 <= v <= 8:
                return v
    except Exception:
        pass
    try:
        kind = jax.devices()[0].device_kind.lower()
    except Exception:
        return 1
    if ("v7" in kind) or ("v5p" in kind) or ("v4" in kind):
        return 2
    return 1


def plan_tiling(n_points, *, max_tile=4096, n_cores=None):
    """Returns (tm, n_total, steps) with n_total = steps*tm, tm % 128 == 0,
    and padding bounded by < 128*steps lanes."""
    if n_cores is None:
        n_cores = _tensorcores_per_chip()
    max_tile = _round_up(max(max_tile, 128), 128)
    n128 = _round_up(max(n_points, 1), 128)
    steps = pl.cdiv(n128, max_tile)
    if n_cores > 1:
        # Give every TensorCore at least one "parallel" grid step, evenly split.
        steps = _round_up(max(steps, n_cores), n_cores)
    tm = _round_up(pl.cdiv(n128, steps), 128)
    n_total = steps * tm
    return tm, n_total, steps


# ----------------------------------------------------------------------------
# Lane-major entry point (input already padded to (1, n_total) lane-major layout)
# ----------------------------------------------------------------------------
def pinn_forward_lane_major(x_row, params, *, tm, mxu_dtype=None):
    """x_row: (1, L) f32 with L % tm == 0 and tm % 128 == 0.  Returns (1, L) f32."""
    assert x_row.ndim == 2 and x_row.shape[0] == 1
    L = x_row.shape[1]
    assert tm % 128 == 0 and L % tm == 0
    n_layers = len(params)
    assert n_layers >= 2
    n_hidden_matmuls = n_layers - 2
    grid = (L // tm,)

    # ---- flatten params into kernel operands ----
    (w0, b0) = params[0]
    (wL, bL) = params[-1]
    flat_wb = [w0.reshape(-1, 1).astype(jnp.float32),
               b0.reshape(-1, 1).astype(jnp.float32)]          # (n0,1), (n0,1)
    for (w, b) in params[1:-1]:
        w_m = w.astype(mxu_dtype) if mxu_dtype is not None else w.astype(jnp.float32)
        flat_wb.extend([w_m, b.reshape(-1, 1).astype(jnp.float32)])
    flat_wb.extend([wL.reshape(-1, 1).astype(jnp.float32),
                    bL.reshape(1, 1).astype(jnp.float32)])      # (n_last,1), (1,1)

    in_specs = [pl.BlockSpec((1, tm), lambda i: (0, i))]
    for a in flat_wb:
        # Tiny constant operands: whole-array blocks with a constant index_map,
        # so they are fetched once per pipeline fill (kept double-buffer default
        # for portability; total weight footprint is only a few KiB).
        in_specs.append(pl.BlockSpec(a.shape, lambda i: (0, 0)))
    out_spec = pl.BlockSpec((1, tm), lambda i: (0, i))

    # ---- advisory cost estimate for the XLA scheduler ----
    w_sizes = [int(w.size) for (w, _) in params]
    act_sizes = [int(b.size) for (_, b) in params[:-1]]
    flops = int(2 * L * sum(w_sizes))
    transcendentals = int(L * sum(act_sizes))
    bytes_accessed = int(2 * 4 * L + sum(int(a.size) * a.dtype.itemsize for a in flat_wb))

    kernel = functools.partial(mlp_kernel, n_hidden_matmuls)

    out_row = pl.pallas_call(
        kernel,
        out_shape=jax.ShapeDtypeStruct((1, L), jnp.float32),
        grid_spec=pltpu.PrefetchScalarGridSpec(
            num_scalar_prefetch=0,
            grid=grid,
            in_specs=in_specs,
            out_specs=out_spec,
        ),
        compiler_params=pltpu.CompilerParams(
            dimension_semantics=("parallel",),   # shard steps across TCs on v7x
        ),
        cost_estimate=pl.CostEstimate(
            flops=flops,
            transcendentals=transcendentals,
            bytes_accessed=bytes_accessed,
        ),
    )(x_row, *flat_wb)
    return out_row


# ----------------------------------------------------------------------------
# Convenience wrapper: (N, 1) -> (N, 1), pads / slices around the kernel
# ----------------------------------------------------------------------------
def pinn_forward_pallas(x, params, *, max_tile=4096, mxu_dtype=None):
    """Forward pass of PINN_Cos_nD as a Pallas TPU kernel.

    x: (N, 1) float32 (any N; padded internally to 128-lane multiples).
    params: list of (W (out,in), b (out,)) float32 in torch layout.
    mxu_dtype: optional dtype (e.g. jnp.bfloat16) for the hidden-layer MXU
               operands; accumulation, bias-add and tanh stay f32.
    Returns: (N, 1) float32.
    """
    N = x.shape[0]
    assert x.shape[1] == 1
    tm, n_total, _ = plan_tiling(N, max_tile=max_tile)
    x_row = jnp.pad(x[:, 0].astype(jnp.float32), (0, n_total - N)).reshape(1, n_total)
    out_row = pinn_forward_lane_major(x_row, params, tm=tm, mxu_dtype=mxu_dtype)
    return out_row[0, :N].reshape(N, 1)


# ----------------------------------------------------------------------------
# Pure-JAX reference (torch-convention forward, for sanity check)
# ----------------------------------------------------------------------------
def pinn_forward_ref(x, params, hidden_matmul_dtype=None):
    h = x
    n = len(params)
    for l, (w, b) in enumerate(params):
        if hidden_matmul_dtype is not None and 0 < l < n - 1:
            z = jnp.dot(h.astype(hidden_matmul_dtype),
                        w.T.astype(hidden_matmul_dtype),
                        preferred_element_type=jnp.float32) + b
        else:
            z = h @ w.T + b
        h = jnp.tanh(z) if l < n - 1 else z
    return h


if __name__ == "__main__":
    key = jax.random.PRNGKey(0)

    # Module config (consistent with the PyTorch __init__):
    #   n_hidden_layers=3, neurons=32, activation_function=tanh,
    #   layers: Linear(1,32), Linear(32,32) x2, Linear(32,1).
    n_hidden_layers = 3
    neurons = [32, 32, 32]

    key, pkey, xkey = jax.random.split(key, 3)
    params = init_pinn_params(pkey, n_hidden_layers, neurons)

    # Collocation points x of shape (N, 1) (like torch.linspace(...).reshape(-1, 1));
    # N deliberately not a multiple of 128 to exercise padding.
    N = 1000
    x = jax.random.uniform(xkey, (N, 1), dtype=jnp.float32, minval=-1.0, maxval=1.0)

    # 1) f32 MXU path: exact module semantics, tight check vs f32 reference.
    out = jax.block_until_ready(pinn_forward_pallas(x, params))
    ref = pinn_forward_ref(x, params)
    assert out.shape == (N, 1)
    err = float(jnp.max(jnp.abs(out - ref)))
    assert jnp.allclose(out, ref, atol=1e-5, rtol=1e-4), err

    # 2) bf16 MXU-operand path (perf option for v6e/v7x): check against a
    #    reference that applies the same bf16 casts (same semantics up to
    #    accumulation order).
    out_bf16 = jax.block_until_ready(
        pinn_forward_pallas(x, params, mxu_dtype=jnp.bfloat16))
    ref_bf16 = pinn_forward_ref(x, params, hidden_matmul_dtype=jnp.bfloat16)
    err_bf16 = float(jnp.max(jnp.abs(out_bf16 - ref_bf16)))
    assert jnp.allclose(out_bf16, ref_bf16, atol=1e-3, rtol=1e-2), err_bf16

    print("KERNEL_OK")
</pallas_src>

<mosaic_0001>
module attributes {stable_mosaic.version = 11 : i64} {
  func.func @mlp_kernel(%arg0: i32, %arg1: memref<1x1024xf32, #tpu.memory_space<vmem>>, %arg2: memref<32x1xf32, #tpu.memory_space<vmem>>, %arg3: memref<32x1xf32, #tpu.memory_space<vmem>>, %arg4: memref<32x32xf32, #tpu.memory_space<vmem>>, %arg5: memref<32x1xf32, #tpu.memory_space<vmem>>, %arg6: memref<32x32xf32, #tpu.memory_space<vmem>>, %arg7: memref<32x1xf32, #tpu.memory_space<vmem>>, %arg8: memref<32x1xf32, #tpu.memory_space<vmem>>, %arg9: memref<1x1xf32, #tpu.memory_space<vmem>>, %arg10: memref<1x1024xf32, #tpu.memory_space<vmem>>) attributes {dimension_semantics = [#tpu.dimension_semantics<parallel>], iteration_bounds = array<i64: 1>, scalar_prefetch = 0 : i64, scratch_operands = 0 : i64, tpu.core_type = #tpu.core_type<tc>, window_params = [{transform_indices = @transform_0, window_bounds = array<i64: 1, 1024>}, {pipeline_mode = #tpu.pipeline_mode<synchronous>, transform_indices = @transform_1, window_bounds = array<i64: 32, 1>}, {pipeline_mode = #tpu.pipeline_mode<synchronous>, transform_indices = @transform_2, window_bounds = array<i64: 32, 1>}, {pipeline_mode = #tpu.pipeline_mode<synchronous>, transform_indices = @transform_3, window_bounds = array<i64: 32, 32>}, {pipeline_mode = #tpu.pipeline_mode<synchronous>, transform_indices = @transform_4, window_bounds = array<i64: 32, 1>}, {pipeline_mode = #tpu.pipeline_mode<synchronous>, transform_indices = @transform_5, window_bounds = array<i64: 32, 32>}, {pipeline_mode = #tpu.pipeline_mode<synchronous>, transform_indices = @transform_6, window_bounds = array<i64: 32, 1>}, {pipeline_mode = #tpu.pipeline_mode<synchronous>, transform_indices = @transform_7, window_bounds = array<i64: 32, 1>}, {pipeline_mode = #tpu.pipeline_mode<synchronous>, transform_indices = @transform_8, window_bounds = array<i64: 1, 1>}, {transform_indices = @transform_9, window_bounds = array<i64: 1, 1024>}]} {
    %c0 = arith.constant 0 : index
    %c0_0 = arith.constant 0 : index
    %0 = vector.load %arg1[%c0, %c0_0] : memref<1x1024xf32, #tpu.memory_space<vmem>>, vector<1x1024xf32>
    %c0_1 = arith.constant 0 : index
    %c0_2 = arith.constant 0 : index
    %1 = vector.load %arg2[%c0_1, %c0_2] : memref<32x1xf32, #tpu.memory_space<vmem>>, vector<32x1xf32>
    %c0_3 = arith.constant 0 : index
    %c0_4 = arith.constant 0 : index
    %2 = vector.load %arg3[%c0_3, %c0_4] : memref<32x1xf32, #tpu.memory_space<vmem>>, vector<32x1xf32>
    %3 = vector.broadcast %1 : vector<32x1xf32> to vector<32x1024xf32>
    %4 = vector.broadcast %0 : vector<1x1024xf32> to vector<32x1024xf32>
    %5 = arith.mulf %3, %4 : vector<32x1024xf32>
    %6 = vector.broadcast %2 : vector<32x1xf32> to vector<32x1024xf32>
    %7 = arith.addf %5, %6 : vector<32x1024xf32>
    %8 = math.tanh %7 : vector<32x1024xf32>
    %c0_5 = arith.constant 0 : index
    %c0_6 = arith.constant 0 : index
    %9 = vector.load %arg4[%c0_5, %c0_6] : memref<32x32xf32, #tpu.memory_space<vmem>>, vector<32x32xf32>
    %c0_7 = arith.constant 0 : index
    %c0_8 = arith.constant 0 : index
    %10 = vector.load %arg5[%c0_7, %c0_8] : memref<32x1xf32, #tpu.memory_space<vmem>>, vector<32x1xf32>
    %cst = arith.constant dense<0.000000e+00> : vector<32x1024xf32>
    %11 = tpu.matmul %9, %8, %cst {dimension_numbers = #tpu.dot_dimension_numbers<[1], [0], [0], [1], [0, 0, 1, 1], [], []>} : vector<32x32xf32>, vector<32x1024xf32>, vector<32x1024xf32> -> vector<32x1024xf32>
    %12 = vector.broadcast %10 : vector<32x1xf32> to vector<32x1024xf32>
    %13 = arith.addf %11, %12 : vector<32x1024xf32>
    %14 = math.tanh %13 : vector<32x1024xf32>
    %c0_9 = arith.constant 0 : index
    %c0_10 = arith.constant 0 : index
    %15 = vector.load %arg6[%c0_9, %c0_10] : memref<32x32xf32, #tpu.memory_space<vmem>>, vector<32x32xf32>
    %c0_11 = arith.constant 0 : index
    %c0_12 = arith.constant 0 : index
    %16 = vector.load %arg7[%c0_11, %c0_12] : memref<32x1xf32, #tpu.memory_space<vmem>>, vector<32x1xf32>
    %cst_13 = arith.constant dense<0.000000e+00> : vector<32x1024xf32>
    %17 = tpu.matmul %15, %14, %cst_13 {dimension_numbers = #tpu.dot_dimension_numbers<[1], [0], [0], [1], [0, 0, 1, 1], [], []>} : vector<32x32xf32>, vector<32x1024xf32>, vector<32x1024xf32> -> vector<32x1024xf32>
    %18 = vector.broadcast %16 : vector<32x1xf32> to vector<32x1024xf32>
    %19 = arith.addf %17, %18 : vector<32x1024xf32>
    %20 = math.tanh %19 : vector<32x1024xf32>
    %c0_14 = arith.constant 0 : index
    %c0_15 = arith.constant 0 : index
    %21 = vector.load %arg8[%c0_14, %c0_15] : memref<32x1xf32, #tpu.memory_space<vmem>>, vector<32x1xf32>
    %c0_16 = arith.constant 0 : index
    %c0_17 = arith.constant 0 : index
    %22 = vector.load %arg9[%c0_16, %c0_17] : memref<1x1xf32, #tpu.memory_space<vmem>>, vector<1x1xf32>
    %23 = vector.broadcast %21 : vector<32x1xf32> to vector<32x1024xf32>
    %24 = arith.mulf %23, %20 : vector<32x1024xf32>
    %cst_18 = arith.constant dense<0.000000e+00> : vector<1024xf32>
    %25 = vector.multi_reduction <add>, %24, %cst_18 [0] : vector<32x1024xf32> to vector<1024xf32>
    %26 = vector.shape_cast %25 : vector<1024xf32> to vector<1x1024xf32>
    %27 = vector.broadcast %22 : vector<1x1xf32> to vector<1x1024xf32>
    %28 = arith.addf %26, %27 : vector<1x1024xf32>
    %c0_19 = arith.constant 0 : index
    %c0_20 = arith.constant 0 : index
    %29 = vector.load %arg10[%c0_19, %c0_20] : memref<1x1024xf32, #tpu.memory_space<vmem>>, vector<1x1024xf32>
    tpu.vector_store %arg10[%c0_19, %c0_20], %28 {strides = array<i32>} : memref<1x1024xf32, #tpu.memory_space<vmem>>, vector<1x1024xf32>,
    return
  }
  func.func @transform_0(%arg0: i32) -> (i32, i32) {
    %c0_i32 = arith.constant 0 : i32
    %c0_i32_0 = arith.constant 0 : i32
    return %c0_i32, %arg0 : i32, i32
  }
  func.func @transform_1(%arg0: i32) -> (i32, i32) {
    %c0_i32 = arith.constant 0 : i32
    %c0_i32_0 = arith.constant 0 : i32
    %c0_i32_1 = arith.constant 0 : i32
    return %c0_i32, %c0_i32_0 : i32, i32
  }
  func.func @transform_2(%arg0: i32) -> (i32, i32) {
    %c0_i32 = arith.constant 0 : i32
    %c0_i32_0 = arith.constant 0 : i32
    %c0_i32_1 = arith.constant 0 : i32
    return %c0_i32, %c0_i32_0 : i32, i32
  }
  func.func @transform_3(%arg0: i32) -> (i32, i32) {
    %c0_i32 = arith.constant 0 : i32
    %c0_i32_0 = arith.constant 0 : i32
    %c0_i32_1 = arith.constant 0 : i32
    return %c0_i32, %c0_i32_0 : i32, i32
  }
  func.func @transform_4(%arg0: i32) -> (i32, i32) {
    %c0_i32 = arith.constant 0 : i32
    %c0_i32_0 = arith.constant 0 : i32
    %c0_i32_1 = arith.constant 0 : i32
    return %c0_i32, %c0_i32_0 : i32, i32
  }
  func.func @transform_5(%arg0: i32) -> (i32, i32) {
    %c0_i32 = arith.constant 0 : i32
    %c0_i32_0 = arith.constant 0 : i32
    %c0_i32_1 = arith.constant 0 : i32
    return %c0_i32, %c0_i32_0 : i32, i32
  }
  func.func @transform_6(%arg0: i32) -> (i32, i32) {
    %c0_i32 = arith.constant 0 : i32
    %c0_i32_0 = arith.constant 0 : i32
    %c0_i32_1 = arith.constant 0 : i32
    return %c0_i32, %c0_i32_0 : i32, i32
  }
  func.func @transform_7(%arg0: i32) -> (i32, i32) {
    %c0_i32 = arith.constant 0 : i32
    %c0_i32_0 = arith.constant 0 : i32
    %c0_i32_1 = arith.constant 0 : i32
    return %c0_i32, %c0_i32_0 : i32, i32
  }
  func.func @transform_8(%arg0: i32) -> (i32, i32) {
    %c0_i32 = arith.constant 0 : i32
    %c0_i32_0 = arith.constant 0 : i32
    %c0_i32_1 = arith.constant 0 : i32
    return %c0_i32, %c0_i32_0 : i32, i32
  }
  func.func @transform_9(%arg0: i32) -> (i32, i32) {
    %c0_i32 = arith.constant 0 : i32
    %c0_i32_0 = arith.constant 0 : i32
    return %c0_i32, %arg0 : i32, i32
  }
}

</mosaic_0001>

<bundles_post_ra>
// kernel: tpu_custom_call.1
= control target key start
LH: loop header
LB: loop body
LE: loop exit
PB: predicated region body
PF: predicated region fallthrough
CT: control target
= control target key end

     0   :  { %s1797_s0 = inlined_call_operand.vmem [shape: f32[1,1024], index: 0, kind: input, shape index: {}]   ;;  %s1798_s1 = inlined_call_operand.vmem [shape: f32[32,1], index: 1, kind: input, shape index: {}]   ;;  %s1799_s2 = inlined_call_operand.vmem [shape: f32[32,1], index: 2, kind: input, shape index: {}]   ;;  %s1800_s3 = inlined_call_operand.vmem [shape: f32[32,32], index: 3, kind: input, shape index: {}]   ;;  %s1801_s4 = inlined_call_operand.vmem [shape: f32[32,1], index: 4, kind: input, shape index: {}]   ;;  %s1802_s5 = inlined_call_operand.vmem [shape: f32[32,32], index: 5, kind: input, shape index: {}]   ;;  %s1803_s6 = inlined_call_operand.vmem [shape: f32[32,1], index: 6, kind: input, shape index: {}]   ;;  %s1804_s7 = inlined_call_operand.vmem [shape: f32[32,1], index: 7, kind: input, shape index: {}]   ;;  %s1805_s8 = inlined_call_operand.<no memory space> [shape: f32[1,1], index: 8, kind: input, shape index: {}]   ;;  %s1806_s9 = inlined_call_operand.hbm [shape: f32[1,1024], index: 9, kind: output, shape index: {}]  }
   0x1   :  { %v14_v0 = vstv %s1805_s8 }
   0x2   :  { %15 = vst [vmem:[#allocation2] sm:$0x1] %v14_v0 }
   0x3   :  { %v43_v1 = vld [vmem:[%s1799_s2 + $0x18] sm:$0xff]  ;;  %v42_v2 = vld [vmem:[%s1799_s2 + $0x10] sm:$0xff]  ;;  %v1283_v4 = vmov 0  }
   0x4   :  { %v39_v3 = vld [vmem:[%s1798_s1 + $0x18] sm:$0xff]  ;;  %1064 = vset.pattern.permute.xlu2 %v1283_v4  ;;  %1063 = vset.pattern.permute.xlu1 %v1283_v4 }
   0x5   :  { %1062 = vset.pattern.permute.xlu0 %v1283_v4  ;;  %130 = vperm.xlu1 %1063, %v43_v1  }
   0x6   :  { %125 = vperm.xlu2 %1064, %v42_v2   ;;  %61 = vperm.xlu0 %1062, %v39_v3  }
   0x7   :  { %16 = vsyncpa [#allocation4], 0  ;;  %v37_v5 = vld [vmem:[%s1798_s1 + $0x8] sm:$0xff]  ;;  %v38_v6 = vld [vmem:[%s1798_s1 + $0x10] sm:$0xff]  ;;  %vm225_vm0 = vcmask 261120   ;;  %vm964_vm1 = vcmask 1040384  }
   0x8   :  { %v36_v7 = vld [vmem:[%s1798_s1] sm:$0xff]  ;;  %v41_v9 = vld [vmem:[%s1799_s2 + $0x8] sm:$0xff]  ;;  %v204_v10 = vld [vmem:[%s1801_s4 + $0x18] sm:$0xff]  ;;  %vm966_vm2 = vcmask 1042434   ;;  %vm970_vm3 = vcmask 1044484   ;;  %vm972_vm4 = vcmask 1046534  }
   0x9   :  { %v40_v8 = vld [vmem:[%s1799_s2] sm:$0xff]  ;;  %v202_v11 = vld [vmem:[%s1801_s4 + $0x8] sm:$0xff]  ;;  %v203_v12 = vld [vmem:[%s1801_s4 + $0x10] sm:$0xff]  ;;  %vm968_vm5 = vcmask 1041408   ;;  %vm974_vm6 = vcmask 1045508   ;;  %s987_s17 = sshll.u32 %s1806_s9, 4  ;;  %s988_s17 = int_to_ptr.hbm [resolvable:$true] %s987_s17 }
   0xa   :  { %v201_v13 = vld [vmem:[%s1801_s4] sm:$0xff]  ;;  %v507_v14 = vld [vmem:[%s1803_s6 + $0x8] sm:$0xff]  ;;  %v508_v16 = vld [vmem:[%s1803_s6 + $0x10] sm:$0xff]  ;;  %vm976_vm7 = vcmask 1043456  }
   0xb   :  { %v506_v15 = vld [vmem:[%s1803_s6] sm:$0xff]  ;;  %v509_v18 = vld [vmem:[%s1803_s6 + $0x18] sm:$0xff]  ;;  %v807_v19 = vld [vmem:[%s1804_s7 + $0x8] sm:$0xff] }
   0xc   :  { %v806_v17 = vld [vmem:[%s1804_s7] sm:$0xff]  ;;  %v809_v20 = vld [vmem:[%s1804_s7 + $0x18] sm:$0xff]  ;;  %v808_v21 = vld [vmem:[%s1804_s7 + $0x10] sm:$0xff] }
   0xd   :  { %51 = vperm.xlu1 %1063, %v37_v5   ;;  %v810_v22 = vld [vmem:[#allocation2] sm:$0x1] }
   0xe   :  { %56 = vperm.xlu0 %1062, %v38_v6   ;;  %46 = vperm.xlu2 %1064, %v36_v7   ;;  %v35_v23 = vld [vmem:[%s1797_s0] sm:$0xff] }
   0xf   :  { %v65_v24 = vperm.slane %v35_v23, 0  ;;  %v66_v25 = vperm.slane %v35_v23, 1  ;;  %v1401_v26 = vperm.slane %v35_v23, 2  ;;  %v1403_v27 = vperm.slane %v35_v23, 3 }
  0x10   :  { %v1409_v30 = vperm.slane %v35_v23, 4  ;;  %v1425_v41 = vperm.slane %v35_v23, 5  ;;  %v1448_v61 = vperm.slane %v35_v23, 6  ;;  %v1450_v62 = vperm.slane %v35_v23, 7 }
  0x15   :  { %115 = vperm.xlu1 %1063, %v40_v8  }
  0x16   :  { %120 = vperm.xlu0 %1062, %v41_v9   ;;  %222 = vperm.xlu2 %1064, %v204_v10  }
  0x1d   :  { %212 = vperm.xlu1 %1063, %v202_v11  }
  0x1e   :  { %217 = vperm.xlu0 %1062, %v203_v12   ;;  %207 = vperm.xlu2 %1064, %v201_v13  }
  0x25   :  { %517 = vperm.xlu1 %1063, %v507_v14  }
  0x26   :  { %512 = vperm.xlu0 %1062, %v506_v15   ;;  %522 = vperm.xlu2 %1064, %v508_v16  }
  0x2d   :  { %813 = vperm.xlu1 %1063, %v806_v17  }
  0x2e   :  { %527 = vperm.xlu0 %1062, %v509_v18   ;;  %818 = vperm.xlu2 %1064, %v807_v19  }
  0x35   :  { %828 = vperm.xlu1 %1063, %v809_v20  }
  0x36   :  { %823 = vperm.xlu0 %1062, %v808_v21   ;;  %937 = vperm.xlu2 %1064, %v810_v22  }
  0x60   :  { %v1417_v35 = vpop.permute.xlu2 %125 }
  0x68   :  { %v1444_v57 = vpop.permute.xlu2 %46 }
  0x69   :  { %v81_v60 = vmul.f32 %v65_v24, %v1444_v57  ;;  %v82_v6 = vmul.f32 %v66_v25, %v1444_v57  ;;  %v83_v12 = vmul.f32 %v1401_v26, %v1444_v57  ;;  %v84_v16 = vmul.f32 %v1403_v27, %v1444_v57 }
  0x77   :  { %v1405_v28 = vpop.permute.xlu1 %130 }
  0x78   :  { %v1407_v29 = vpop.permute.xlu0 %61 }
  0x79   :  { %v105_v31 = vmul.f32 %v65_v24, %v1407_v29  ;;  %v106_v32 = vmul.f32 %v66_v25, %v1407_v29  ;;  %v107_v33 = vmul.f32 %v1401_v26, %v1407_v29  ;;  %v108_v34 = vmul.f32 %v1403_v27, %v1407_v29 }
  0x7a   :  { %v109_v40 = vmul.f32 %v1409_v30, %v1407_v29  ;;  %v110_v45 = vmul.f32 %v1425_v41, %v1407_v29  ;;  %v111_v13 = vmul.f32 %v1448_v61, %v1407_v29  ;;  %v112_v17 = vmul.f32 %v1450_v62, %v1407_v29 }
  0x7b   :  { %v157_v36 = vadd.f32 %v1405_v28, %v105_v31  ;;  %v158_v37 = vadd.f32 %v1405_v28, %v106_v32  ;;  %v159_v38 = vadd.f32 %v1405_v28, %v107_v33  ;;  %v160_v39 = vadd.f32 %v1405_v28, %v108_v34 }
  0x7c   :  { %v161_v44 = vadd.f32 %v1405_v28, %v109_v40  ;;  %v162_v58 = vadd.f32 %v1405_v28, %v110_v45  ;;  %v164_v29 = vadd.f32 %v1405_v28, %v112_v17 }
  0x7d   :  { %1065 = vtanh.f32 %v157_v36 }
  0x7e   :  { %1067 = vtanh.f32 %v158_v37 }
  0x7f   :  { %v1427_v42 = vpop.permute.xlu1 %51  ;;  %1069 = vtanh.f32 %v159_v38  ;;  %v1494_v38 = vld [vmem:[%s1800_s3] sm:$0xff] }
  0x80   :  { %v1429_v43 = vpop.permute.xlu0 %56  ;;  %1071 = vtanh.f32 %v160_v39  ;;  %v89_v0 = vmul.f32 %v65_v24, %v1427_v42  ;;  %v90_v1 = vmul.f32 %v66_v25, %v1427_v42  ;;  %v91_v2 = vmul.f32 %v1401_v26, %v1427_v42 }
  0x81   :  { %v97_v46 = vmul.f32 %v65_v24, %v1429_v43  ;;  %v98_v47 = vmul.f32 %v66_v25, %v1429_v43  ;;  %v99_v48 = vmul.f32 %v1401_v26, %v1429_v43  ;;  %v100_v49 = vmul.f32 %v1403_v27, %v1429_v43 }
  0x82   :  { %1073 = vtanh.f32 %v161_v44  ;;  %v92_v4 = vmul.f32 %v1403_v27, %v1427_v42  ;;  %v101_v20 = vmul.f32 %v1409_v30, %v1429_v43  ;;  %v102_v23 = vmul.f32 %v1425_v41, %v1429_v43 }
  0x83   :  { %v1066_v50 = vpop.eup %1065  ;;  %v149_v51 = vadd.f32 %v1417_v35, %v97_v46  ;;  %v150_v52 = vadd.f32 %v1417_v35, %v98_v47  ;;  %v151_v53 = vadd.f32 %v1417_v35, %v99_v48  ;;  %v152_v55 = vadd.f32 %v1417_v35, %v100_v49 }
  0x84   :  { %v1068_v54 = vpop.eup %1067  ;;  %250 = vmatpush.msra.mxu0 %v1066_v50  ;;  %v163_v25 = vadd.f32 %v1405_v28, %v111_v13  ;;  %v103_v26 = vmul.f32 %v1448_v61, %v1429_v43  ;;  %v104_v31 = vmul.f32 %v1450_v62, %v1429_v43  ;;  %v153_v33 = vadd.f32 %v1417_v35, %v101_v20 }
  0x85   :  { %v1070_v56 = vpop.eup %1069  ;;  %279 = vmatpush.msra.mxu1 %v1068_v54  ;;  %1075 = vtanh.f32 %v149_v51  ;;  %v154_v36 = vadd.f32 %v1417_v35, %v102_v23  ;;  %v93_v39 = vmul.f32 %v1409_v30, %v1427_v42  ;;  %v94_v44 = vmul.f32 %v1425_v41, %v1427_v42 }
  0x86   :  { %v1072_v59 = vpop.eup %1071  ;;  %308 = vmatpush.msra.mxu2 %v1070_v56  ;;  %1077 = vtanh.f32 %v150_v52  ;;  %v155_v28 = vadd.f32 %v1417_v35, %v103_v26  ;;  %v156_v43 = vadd.f32 %v1417_v35, %v104_v31  ;;  %v95_v47 = vmul.f32 %v1448_v61, %v1427_v42 }
  0x87   :  { %337 = vmatpush.msra.mxu3 %v1072_v59  ;;  %v1452_v63 = vpop.permute.xlu1 %115  ;;  %1079 = vtanh.f32 %v151_v53  ;;  %v96_v49 = vmul.f32 %v1450_v62, %v1427_v42  ;;  %v85_v52 = vmul.f32 %v1409_v30, %v1444_v57  ;;  %v86_v42 = vmul.f32 %v1425_v41, %v1444_v57 }
  0x88   :  { %v1458_v3 = vpop.permute.xlu0 %120  ;;  %1081 = vtanh.f32 %v152_v55  ;;  %v133_v5 = vadd.f32 %v1452_v63, %v81_v60  ;;  %v1074_v10 = vpop.eup %1073  ;;  %v134_v15 = vadd.f32 %v1452_v63, %v82_v6  ;;  %v135_v19 = vadd.f32 %v1452_v63, %v83_v12 }
  0x89   :  { %v141_v7 = vadd.f32 %v1458_v3, %v89_v0  ;;  %v142_v8 = vadd.f32 %v1458_v3, %v90_v1  ;;  %v143_v9 = vadd.f32 %v1458_v3, %v91_v2  ;;  %1083 = vtanh.f32 %v162_v58 }
  0x8a   :  { %v144_v11 = vadd.f32 %v1458_v3, %v92_v4  ;;  %1085 = vtanh.f32 %v133_v5  ;;  %v136_v22 = vadd.f32 %v1452_v63, %v84_v16  ;;  %v145_v46 = vadd.f32 %v1458_v3, %v93_v39 }
  0x8b   :  { %v1076_v14 = vpop.eup %1075  ;;  %1087 = vtanh.f32 %v141_v7  ;;  %v146_v35 = vadd.f32 %v1458_v3, %v94_v44  ;;  %v147_v51 = vadd.f32 %v1458_v3, %v95_v47  ;;  %v148_v54 = vadd.f32 %v1458_v3, %v96_v49  ;;  %v199_v7 = vld [vmem:[%s1800_s3 + $0x10] sm:$0xff] }
  0x8c   :  { %v1078_v18 = vpop.eup %1077  ;;  %251 = vmatpush.msra.mxu0 %v1076_v14  ;;  %1089 = vtanh.f32 %v142_v8  ;;  %v137_v56 = vadd.f32 %v1452_v63, %v85_v52  ;;  %v87_v30 = vmul.f32 %v1448_v61, %v1444_v57  ;;  %v138_v59 = vadd.f32 %v1452_v63, %v86_v42  ;;  %v198_v61 = vld [vmem:[%s1800_s3 + $0x8] sm:$0xff] }
  0x8d   :  { %v1080_v21 = vpop.eup %1079  ;;  %280 = vmatpush.msra.mxu1 %v1078_v18  ;;  %1091 = vtanh.f32 %v143_v9  ;;  %v88_v41 = vmul.f32 %v1450_v62, %v1444_v57 }
  0x8e   :  { %v1082_v24 = vpop.eup %1081  ;;  %309 = vmatpush.msra.mxu2 %v1080_v21  ;;  %1093 = vtanh.f32 %v144_v11  ;;  %v139_v0 = vadd.f32 %v1452_v63, %v87_v30  ;;  %v200_v11 = vld [vmem:[%s1800_s3 + $0x18] sm:$0xff] }
  0x8f   :  { %v1084_v27 = vpop.eup %1083  ;;  %338 = vmatpush.msra.mxu3 %v1082_v24  ;;  %1095 = vtanh.f32 %v134_v15  ;;  %v140_v2 = vadd.f32 %v1452_v63, %v88_v41 }
  0x90   :  { %v1086_v32 = vpop.eup %1085  ;;  %1097 = vtanh.f32 %v135_v19  ;;  %v1571_v19 = vpop.permute.xlu2 %222 }
  0x91   :  { %v1088_v34 = vpop.eup %1087  ;;  %1099 = vtanh.f32 %v136_v22  ;;  %v1573_v23 = vpop.permute.xlu0 %217 }
  0x92   :  { %v1090_v37 = vpop.eup %1089  ;;  %252 = vmatpush.msra.mxu0 %v1088_v34  ;;  %1101 = vtanh.f32 %v163_v25  ;;  %v1575_v25 = vpop.permute.xlu1 %212 }
  0x93   :  { %v1092_v40 = vpop.eup %1091  ;;  %281 = vmatpush.msra.mxu1 %v1090_v37  ;;  %1103 = vtanh.f32 %v164_v29 }
  0x94   :  { %v1094_v45 = vpop.eup %1093  ;;  %310 = vmatpush.msra.mxu2 %v1092_v40  ;;  %253 = vmatpush.msra.mxu0 %v1086_v32  ;;  %1105 = vtanh.f32 %v153_v33 }
  0x95   :  { %v1096_v48 = vpop.eup %1095  ;;  %339 = vmatpush.msra.mxu3 %v1094_v45  ;;  %996 = vmatmul.msk.f32.vlgmr.msra.gmra.mxu0 %vm225_vm0, %v1494_v38  ;;  %1107 = vtanh.f32 %v154_v36 }
  0x96   :  { %v1098_v50 = vpop.eup %1097  ;;  %282 = vmatpush.msra.mxu1 %v1096_v48  ;;  %366 = vmatpush.msrb.mxu0 %v1074_v10  ;;  %1109 = vtanh.f32 %v155_v28 }
  0x97   :  { %v1100_v53 = vpop.eup %1099  ;;  %311 = vmatpush.msra.mxu2 %v1098_v50  ;;  %1000 = vmatmul.msk.f32.vlgmr.msra.gmra.mxu1 %vm225_vm0, %v1494_v38  ;;  %1111 = vtanh.f32 %v156_v43 }
  0x98   :  { %v1102_v55 = vpop.eup %1101  ;;  %340 = vmatpush.msra.mxu3 %v1100_v53  ;;  %1004 = vmatmul.msk.f32.vlgmr.msra.gmra.mxu2 %vm225_vm0, %v1494_v38  ;;  %1113 = vtanh.f32 %v145_v46  ;;  %v1581_v36 = vpop.permute.xlu2 %207 }
  0x99   :  { %v1104_v58 = vpop.eup %1103  ;;  %1008 = vmatmul.msk.f32.vlgmr.msra.gmra.mxu3 %vm225_vm0, %v1494_v38  ;;  %395 = vmatpush.msrb.mxu1 %v1084_v27  ;;  %1115 = vtanh.f32 %v146_v35 }
  0x9a   :  { %v1106_v60 = vpop.eup %1105  ;;  %424 = vmatpush.msrb.mxu2 %v1102_v55  ;;  %453 = vmatpush.msrb.mxu3 %v1104_v58  ;;  %1117 = vtanh.f32 %v147_v51 }
  0x9b   :  { %v1108_v1 = vpop.eup %1107  ;;  %367 = vmatpush.msrb.mxu0 %v1106_v60  ;;  %1119 = vtanh.f32 %v148_v54 }
  0x9c   :  { %v1110_v3 = vpop.eup %1109  ;;  %396 = vmatpush.msrb.mxu1 %v1108_v1  ;;  %1121 = vtanh.f32 %v137_v56  ;;  %v1601_v56 = vld [vmem:[%s1802_s5] sm:$0xff] }
  0x9d   :  { %v1112_v4 = vpop.eup %1111  ;;  %425 = vmatpush.msrb.mxu2 %v1110_v3  ;;  %1123 = vtanh.f32 %v138_v59  ;;  %997 = vmatmul.msk.f32.gmra.mxu0 %vm225_vm0, %v198_v61 }
  0x9e   :  { %v1114_v57 = vpop.eup %1113  ;;  %454 = vmatpush.msrb.mxu3 %v1112_v4  ;;  %1125 = vtanh.f32 %v139_v0 }
  0x9f   :  { %v1116_v62 = vpop.eup %1115  ;;  %368 = vmatpush.msrb.mxu0 %v1114_v57  ;;  %1127 = vtanh.f32 %v140_v2  ;;  %1001 = vmatmul.msk.f32.gmra.mxu1 %vm225_vm0, %v198_v61 }
  0xa0   :  { %v1118_v5 = vpop.eup %1117  ;;  %397 = vmatpush.msrb.mxu1 %v1116_v62  ;;  %1005 = vmatmul.msk.f32.gmra.mxu2 %vm225_vm0, %v198_v61 }
  0xa1   :  { %v1120_v63 = vpop.eup %1119  ;;  %426 = vmatpush.msrb.mxu2 %v1118_v5  ;;  %1009 = vmatmul.msk.f32.gmra.mxu3 %vm225_vm0, %v198_v61  ;;  %v1615_v5 = vld [vmem:[%s1802_s5 + $0x8] sm:$0xff] }
  0xa2   :  { %v1122_v6 = vpop.eup %1121  ;;  %455 = vmatpush.msrb.mxu3 %v1120_v63 }
  0xa3   :  { %v1124_v8 = vpop.eup %1123  ;;  %369 = vmatpush.msrb.mxu0 %v1122_v6 }
  0xa4   :  { %v1126_v9 = vpop.eup %1125  ;;  %398 = vmatpush.msrb.mxu1 %v1124_v8 }
  0xa5   :  { %v1128_v10 = vpop.eup %1127  ;;  %427 = vmatpush.msrb.mxu2 %v1126_v9  ;;  %998 = vmatmul.msk.f32.gmra.mxu0 %vm225_vm0, %v199_v7 }
  0xa6   :  { %456 = vmatpush.msrb.mxu3 %v1128_v10 }
  0xa7   :  { %1002 = vmatmul.msk.f32.gmra.mxu1 %vm225_vm0, %v199_v7 }
  0xa8   :  { %1006 = vmatmul.msk.f32.gmra.mxu2 %vm225_vm0, %v199_v7 }
  0xa9   :  { %1010 = vmatmul.msk.f32.gmra.mxu3 %vm225_vm0, %v199_v7 }
  0xad   :  { %999 = vmatmul.msk.f32.gmra.mxu0 %vm225_vm0, %v200_v11 }
  0xaf   :  { %1003 = vmatmul.msk.f32.gmra.mxu1 %vm225_vm0, %v200_v11 }
  0xb0   :  { %1007 = vmatmul.msk.f32.gmra.mxu2 %vm225_vm0, %v200_v11 }
  0xb1   :  { %1011 = vmatmul.msk.f32.gmra.mxu3 %vm225_vm0, %v200_v11 }
  0xb5   :  { %1012 = vmatmul.msk.f32.vlgmr.msrb.gmra.mxu0 %vm225_vm0, %v1494_v38 }
  0xb7   :  { %1016 = vmatmul.msk.f32.vlgmr.msrb.gmra.mxu1 %vm225_vm0, %v1494_v38 }
  0xb8   :  { %1020 = vmatmul.msk.f32.vlgmr.msrb.gmra.mxu2 %vm225_vm0, %v1494_v38 }
  0xb9   :  { %1024 = vmatmul.msk.f32.vlgmr.msrb.gmra.mxu3 %vm225_vm0, %v1494_v38 }
  0xbd   :  { %1013 = vmatmul.msk.f32.gmra.mxu0 %vm225_vm0, %v198_v61 }
  0xbf   :  { %1017 = vmatmul.msk.f32.gmra.mxu1 %vm225_vm0, %v198_v61 }
  0xc0   :  { %1021 = vmatmul.msk.f32.gmra.mxu2 %vm225_vm0, %v198_v61 }
  0xc1   :  { %1025 = vmatmul.msk.f32.gmra.mxu3 %vm225_vm0, %v198_v61 }
  0xc5   :  { %1014 = vmatmul.msk.f32.gmra.mxu0 %vm225_vm0, %v199_v7 }
  0xc7   :  { %1018 = vmatmul.msk.f32.gmra.mxu1 %vm225_vm0, %v199_v7 }
  0xc8   :  { %1022 = vmatmul.msk.f32.gmra.mxu2 %vm225_vm0, %v199_v7 }
  0xc9   :  { %1026 = vmatmul.msk.f32.gmra.mxu3 %vm225_vm0, %v199_v7 }
  0xcd   :  { %1015 = vmatmul.msk.f32.gmra.mxu0 %vm225_vm0, %v200_v11 }
  0xcf   :  { %1019 = vmatmul.msk.f32.gmra.mxu1 %vm225_vm0, %v200_v11 }
  0xd0   :  { %1023 = vmatmul.msk.f32.gmra.mxu2 %vm225_vm0, %v200_v11 }
  0xd1   :  { %1027 = vmatmul.msk.f32.gmra.mxu3 %vm225_vm0, %v200_v11 }
 0x112   :  { %v255_v12 = vpop.f32.mrf.mxu0 }
 0x113   :  { %v256_v38 = vadd.f32 %v255_v12, %v1581_v36  ;;  %v1628_v12 = vld [vmem:[%s1802_s5 + $0x10] sm:$0xff] }
 0x114   :  { %v284_v13 = vpop.f32.mrf.mxu1 }
 0x115   :  { %v285_v39 = vadd.f32 %v284_v13, %v1581_v36 }
 0x11a   :  { %v258_v14 = vpop.f32.mrf.mxu0 }
 0x11b   :  { %v313_v15 = vpop.f32.mrf.mxu2  ;;  %v259_v33 = vadd.f32 %v258_v14, %v1575_v25 }
 0x11c   :  { %v342_v16 = vpop.f32.mrf.mxu3  ;;  %v287_v17 = vpop.f32.mrf.mxu1  ;;  %v314_v55 = vadd.f32 %v313_v15, %v1581_v36 }
 0x11d   :  { %v288_v28 = vadd.f32 %v287_v17, %v1575_v25  ;;  %v343_v58 = vadd.f32 %v342_v16, %v1581_v36 }
 0x122   :  { %v261_v18 = vpop.f32.mrf.mxu0 }
 0x123   :  { %v316_v20 = vpop.f32.mrf.mxu2  ;;  %v262_v26 = vadd.f32 %v261_v18, %v1573_v23 }
 0x124   :  { %v345_v21 = vpop.f32.mrf.mxu3  ;;  %v290_v22 = vpop.f32.mrf.mxu1  ;;  %v317_v52 = vadd.f32 %v316_v20, %v1575_v25 }
 0x125   :  { %v291_v37 = vadd.f32 %v290_v22, %v1573_v23  ;;  %v346_v54 = vadd.f32 %v345_v21, %v1575_v25 }
 0x12a   :  { %v264_v24 = vpop.f32.mrf.mxu0 }
 0x12b   :  { %v319_v27 = vpop.f32.mrf.mxu2  ;;  %v265_v29 = vadd.f32 %v264_v24, %v1571_v19 }
 0x12c   :  { %v348_v31 = vpop.f32.mrf.mxu3  ;;  %v293_v32 = vpop.f32.mrf.mxu1  ;;  %v320_v45 = vadd.f32 %v319_v27, %v1573_v23  ;;  %v1649_v27 = vld [vmem:[%s1802_s5 + $0x18] sm:$0xff]  ;;  %s1284_s5 = smov [#allocation3]  }
 0x12d   :  { %1129 = vtanh.f32 %v265_v29  ;;  %v294_v34 = vadd.f32 %v293_v32, %v1571_v19  ;;  %v349_v49 = vadd.f32 %v348_v31, %v1573_v23  ;;  %s985_s16 = sshll.u32 %s1284_s5, 4  ;;  %s986_s16 = int_to_ptr.vmem [resolvable:$true] %s985_s16 }
 0x12e   :  { %1131 = vtanh.f32 %v262_v26 }
 0x12f   :  { %1133 = vtanh.f32 %v294_v34 }
 0x130   :  { %1135 = vtanh.f32 %v259_v33 }
 0x131   :  { %1137 = vtanh.f32 %v291_v37 }
 0x132   :  { %v1587_v40 = vpop.f32.mrf.mxu0  ;;  %1139 = vtanh.f32 %v256_v38 }
 0x133   :  { %v1130_v43 = vpop.eup %1129  ;;  %v322_v44 = vpop.f32.mrf.mxu2  ;;  %1141 = vtanh.f32 %v288_v28  ;;  %v372_v24 = vadd.f32 %v1587_v40, %v1581_v36 }
 0x134   :  { %v323_v46 = vadd.f32 %v322_v44, %v1571_v19  ;;  %v351_v47 = vpop.f32.mrf.mxu3  ;;  %v1591_v48 = vpop.f32.mrf.mxu1  ;;  %554 = vmatpush.msra.mxu0 %v1130_v43  ;;  %1143 = vtanh.f32 %v285_v39 }
 0x135   :  { %v1132_v35 = vpop.eup %1131  ;;  %v352_v50 = vadd.f32 %v351_v47, %v1571_v19  ;;  %v401_v29 = vadd.f32 %v1591_v48, %v1581_v36 }
 0x136   :  { %v1134_v51 = vpop.eup %1133  ;;  %1145 = vtanh.f32 %v323_v46  ;;  %555 = vmatpush.msra.mxu0 %v1132_v35 }
 0x137   :  { %v1136_v53 = vpop.eup %1135  ;;  %1147 = vtanh.f32 %v352_v50  ;;  %583 = vmatpush.msra.mxu1 %v1134_v51 }
 0x138   :  { %v1138_v42 = vpop.eup %1137  ;;  %1149 = vtanh.f32 %v320_v45  ;;  %556 = vmatpush.msra.mxu0 %v1136_v53 }
 0x139   :  { %v1140_v30 = vpop.eup %1139  ;;  %1151 = vtanh.f32 %v349_v49  ;;  %584 = vmatpush.msra.mxu1 %v1138_v42 }
 0x13a   :  { %v1142_v59 = vpop.eup %1141  ;;  %1153 = vtanh.f32 %v317_v52  ;;  %v374_v41 = vpop.f32.mrf.mxu0  ;;  %557 = vmatpush.msra.mxu0 %v1140_v30 }
 0x13b   :  { %v1144_v60 = vpop.eup %1143  ;;  %1155 = vtanh.f32 %v346_v54  ;;  %v1604_v0 = vpop.f32.mrf.mxu2  ;;  %585 = vmatpush.msra.mxu1 %v1142_v59  ;;  %1028 = vmatmul.msk.f32.vlgmr.msra.gmra.mxu0 %vm225_vm0, %v1601_v56  ;;  %v375_v20 = vadd.f32 %v374_v41, %v1575_v25 }
 0x13c   :  { %v1146_v61 = vpop.eup %1145  ;;  %1157 = vtanh.f32 %v314_v55  ;;  %v1608_v1 = vpop.f32.mrf.mxu3 }
 0x13d   :  { %v403_v2 = vpop.f32.mrf.mxu1  ;;  %v1148_v3 = vpop.eup %1147  ;;  %1159 = vtanh.f32 %v343_v58  ;;  %586 = vmatpush.msra.mxu1 %v1144_v60  ;;  %612 = vmatpush.msra.mxu2 %v1146_v61  ;;  %v459_v47 = vadd.f32 %v1608_v1, %v1581_v36 }
 0x13e   :  { %v1150_v4 = vpop.eup %1149  ;;  %641 = vmatpush.msra.mxu3 %v1148_v3  ;;  %1032 = vmatmul.msk.f32.vlgmr.msra.gmra.mxu1 %vm225_vm0, %v1601_v56  ;;  %v404_v26 = vadd.f32 %v403_v2, %v1575_v25  ;;  %v1709_v3 = vpop.permute.xlu0 %512 }
 0x13f   :  { %v1152_v57 = vpop.eup %1151  ;;  %613 = vmatpush.msra.mxu2 %v1150_v4 }
 0x140   :  { %v1154_v62 = vpop.eup %1153  ;;  %642 = vmatpush.msra.mxu3 %v1152_v57 }
 0x141   :  { %v1156_v63 = vpop.eup %1155  ;;  %614 = vmatpush.msra.mxu2 %v1154_v62 }
 0x142   :  { %v1158_v6 = vpop.eup %1157  ;;  %643 = vmatpush.msra.mxu3 %v1156_v63  ;;  %v377_v7 = vpop.f32.mrf.mxu0 }
 0x143   :  { %v1160_v8 = vpop.eup %1159  ;;  %v432_v9 = vpop.f32.mrf.mxu2  ;;  %615 = vmatpush.msra.mxu2 %v1158_v6  ;;  %1029 = vmatmul.msk.f32.gmra.mxu0 %vm225_vm0, %v1615_v5  ;;  %v378_v14 = vadd.f32 %v377_v7, %v1573_v23 }
 0x144   :  { %v461_v10 = vpop.f32.mrf.mxu3  ;;  %644 = vmatpush.msra.mxu3 %v1160_v8  ;;  %1036 = vmatmul.msk.f32.vlgmr.msra.gmra.mxu2 %vm225_vm0, %v1601_v56  ;;  %v433_v43 = vadd.f32 %v432_v9, %v1575_v25  ;;  %v1712_v63 = vpop.permute.xlu1 %517 }
 0x145   :  { %v406_v11 = vpop.f32.mrf.mxu1  ;;  %1040 = vmatmul.msk.f32.vlgmr.msra.gmra.mxu3 %vm225_vm0, %v1601_v56  ;;  %v462_v45 = vadd.f32 %v461_v10, %v1575_v25 }
 0x146   :  { %1033 = vmatmul.msk.f32.gmra.mxu1 %vm225_vm0, %v1615_v5  ;;  %v407_v22 = vadd.f32 %v406_v11, %v1573_v23  ;;  %v1718_v11 = vpop.permute.xlu2 %522 }
 0x14a   :  { %v380_v13 = vpop.f32.mrf.mxu0 }
 0x14b   :  { %v435_v15 = vpop.f32.mrf.mxu2  ;;  %v381_v16 = vadd.f32 %v380_v13, %v1571_v19  ;;  %1030 = vmatmul.msk.f32.gmra.mxu0 %vm225_vm0, %v1628_v12 }
 0x14c   :  { %v464_v17 = vpop.f32.mrf.mxu3  ;;  %1037 = vmatmul.msk.f32.gmra.mxu2 %vm225_vm0, %v1615_v5  ;;  %v436_v33 = vadd.f32 %v435_v15, %v1573_v23 }
 0x14d   :  { %v409_v18 = vpop.f32.mrf.mxu1  ;;  %1041 = vmatmul.msk.f32.gmra.mxu3 %vm225_vm0, %v1615_v5  ;;  %1161 = vtanh.f32 %v381_v16  ;;  %v465_v28 = vadd.f32 %v464_v17, %v1573_v23 }
 0x14e   :  { %v410_v21 = vadd.f32 %v409_v18, %v1571_v19  ;;  %1034 = vmatmul.msk.f32.gmra.mxu1 %vm225_vm0, %v1628_v12  ;;  %1163 = vtanh.f32 %v378_v14 }
 0x150   :  { %1165 = vtanh.f32 %v410_v21 }
 0x151   :  { %1167 = vtanh.f32 %v375_v20  ;;  %v1724_v20 = vpop.permute.xlu0 %527 }
 0x152   :  { %1169 = vtanh.f32 %v407_v22 }
 0x153   :  { %v1162_v31 = vpop.eup %1161  ;;  %1171 = vtanh.f32 %v372_v24  ;;  %v438_v32 = vpop.f32.mrf.mxu2  ;;  %1031 = vmatmul.msk.f32.gmra.mxu0 %vm225_vm0, %v1649_v27 }
 0x154   :  { %1173 = vtanh.f32 %v404_v26  ;;  %v439_v34 = vadd.f32 %v438_v32, %v1571_v19  ;;  %v467_v37 = vpop.f32.mrf.mxu3  ;;  %1038 = vmatmul.msk.f32.gmra.mxu2 %vm225_vm0, %v1628_v12  ;;  %670 = vmatpush.msrb.mxu0 %v1162_v31  ;;  %v1164_v38 = vpop.eup %1163 }
 0x155   :  { %1175 = vtanh.f32 %v401_v29  ;;  %v468_v39 = vadd.f32 %v467_v37, %v1571_v19  ;;  %1042 = vmatmul.msk.f32.gmra.mxu3 %vm225_vm0, %v1628_v12  ;;  %v430_v19 = vadd.f32 %v1604_v0, %v1581_v36 }
 0x156   :  { %v1166_v40 = vpop.eup %1165  ;;  %1177 = vtanh.f32 %v439_v34  ;;  %1035 = vmatmul.msk.f32.gmra.mxu1 %vm225_vm0, %v1649_v27  ;;  %671 = vmatpush.msrb.mxu0 %v1164_v38 }
 0x157   :  { %v1168_v44 = vpop.eup %1167  ;;  %1179 = vtanh.f32 %v468_v39  ;;  %699 = vmatpush.msrb.mxu1 %v1166_v40  ;;  %v1732_v39 = vpop.permute.xlu1 %813 }
 0x158   :  { %v1170_v46 = vpop.eup %1169  ;;  %1181 = vtanh.f32 %v436_v33  ;;  %672 = vmatpush.msrb.mxu0 %v1168_v44 }
 0x159   :  { %v1172_v23 = vpop.eup %1171  ;;  %1183 = vtanh.f32 %v465_v28  ;;  %700 = vmatpush.msrb.mxu1 %v1170_v46 }
 0x15a   :  { %v1174_v48 = vpop.eup %1173  ;;  %1185 = vtanh.f32 %v433_v43  ;;  %673 = vmatpush.msrb.mxu0 %v1172_v23 }
 0x15b   :  { %v1176_v35 = vpop.eup %1175  ;;  %1187 = vtanh.f32 %v462_v45  ;;  %701 = vmatpush.msrb.mxu1 %v1174_v48  ;;  %1044 = vmatmul.msk.f32.vlgmr.msrb.gmra.mxu0 %vm225_vm0, %v1601_v56 }
 0x15c   :  { %v1178_v25 = vpop.eup %1177  ;;  %1189 = vtanh.f32 %v430_v19  ;;  %1039 = vmatmul.msk.f32.gmra.mxu2 %vm225_vm0, %v1649_v27 }
 0x15d   :  { %v1180_v49 = vpop.eup %1179  ;;  %1191 = vtanh.f32 %v459_v47  ;;  %1043 = vmatmul.msk.f32.gmra.mxu3 %vm225_vm0, %v1649_v27  ;;  %702 = vmatpush.msrb.mxu1 %v1176_v35 }
 0x15e   :  { %v1182_v36 = vpop.eup %1181  ;;  %728 = vmatpush.msrb.mxu2 %v1178_v25  ;;  %757 = vmatpush.msrb.mxu3 %v1180_v49 }
 0x15f   :  { %v1184_v50 = vpop.eup %1183  ;;  %1048 = vmatmul.msk.f32.vlgmr.msrb.gmra.mxu1 %vm225_vm0, %v1601_v56 }
 0x160   :  { %v1186_v51 = vpop.eup %1185  ;;  %729 = vmatpush.msrb.mxu2 %v1182_v36  ;;  %758 = vmatpush.msrb.mxu3 %v1184_v50  ;;  %v1741_v50 = vpop.permute.xlu2 %818 }
 0x161   :  { %v1188_v52 = vpop.eup %1187 }
 0x162   :  { %v1190_v53 = vpop.eup %1189  ;;  %730 = vmatpush.msrb.mxu2 %v1186_v51  ;;  %759 = vmatpush.msrb.mxu3 %v1188_v52 }
 0x163   :  { %v1192_v54 = vpop.eup %1191  ;;  %1045 = vmatmul.msk.f32.gmra.mxu0 %vm225_vm0, %v1615_v5 }
 0x164   :  { %731 = vmatpush.msrb.mxu2 %v1190_v53  ;;  %760 = vmatpush.msrb.mxu3 %v1192_v54 }
 0x165   :  { %1052 = vmatmul.msk.f32.vlgmr.msrb.gmra.mxu2 %vm225_vm0, %v1601_v56  ;;  %1056 = vmatmul.msk.f32.vlgmr.msrb.gmra.mxu3 %vm225_vm0, %v1601_v56 }
 0x167   :  { %1049 = vmatmul.msk.f32.gmra.mxu1 %vm225_vm0, %v1615_v5 }
 0x16b   :  { %1046 = vmatmul.msk.f32.gmra.mxu0 %vm225_vm0, %v1628_v12 }
 0x16d   :  { %1053 = vmatmul.msk.f32.gmra.mxu2 %vm225_vm0, %v1615_v5  ;;  %1057 = vmatmul.msk.f32.gmra.mxu3 %vm225_vm0, %v1615_v5 }
 0x16f   :  { %1050 = vmatmul.msk.f32.gmra.mxu1 %vm225_vm0, %v1628_v12 }
 0x173   :  { %1047 = vmatmul.msk.f32.gmra.mxu0 %vm225_vm0, %v1649_v27 }
 0x175   :  { %1054 = vmatmul.msk.f32.gmra.mxu2 %vm225_vm0, %v1628_v12  ;;  %1058 = vmatmul.msk.f32.gmra.mxu3 %vm225_vm0, %v1628_v12 }
 0x177   :  { %1051 = vmatmul.msk.f32.gmra.mxu1 %vm225_vm0, %v1649_v27 }
 0x17d   :  { %1055 = vmatmul.msk.f32.gmra.mxu2 %vm225_vm0, %v1649_v27  ;;  %1059 = vmatmul.msk.f32.gmra.mxu3 %vm225_vm0, %v1649_v27 }
 0x1b8   :  { %v559_v42 = vpop.f32.mrf.mxu0 }
 0x1b9   :  { %v560_v57 = vadd.f32 %v559_v42, %v1709_v3 }
 0x1bb   :  { %v588_v55 = vpop.f32.mrf.mxu1  ;;  %1193 = vtanh.f32 %v560_v57 }
 0x1bc   :  { %v589_v6 = vadd.f32 %v588_v55, %v1709_v3 }
 0x1be   :  { %1195 = vtanh.f32 %v589_v6 }
 0x1c0   :  { %v562_v56 = vpop.f32.mrf.mxu0 }
 0x1c1   :  { %v563_v7 = vadd.f32 %v562_v56, %v1712_v63  ;;  %v1194_v22 = vpop.eup %1193 }
 0x1c3   :  { %v591_v30 = vpop.f32.mrf.mxu1  ;;  %1197 = vtanh.f32 %v563_v7 }
 0x1c4   :  { %v592_v8 = vadd.f32 %v591_v30, %v1712_v63  ;;  %v1196_v26 = vpop.eup %1195  ;;  %v1747_v30 = vpop.permute.xlu0 %823 }
 0x1c6   :  { %1199 = vtanh.f32 %v592_v8 }
 0x1c7   :  { %v617_v58 = vpop.f32.mrf.mxu2 }
 0x1c8   :  { %v646_v59 = vpop.f32.mrf.mxu3  ;;  %v565_v41 = vpop.f32.mrf.mxu0  ;;  %v618_v9 = vadd.f32 %v617_v58, %v1709_v3  ;;  %v832_v58 = vmul.f32 %v1196_v26, %v1732_v39 }
 0x1c9   :  { %v647_v12 = vadd.f32 %v646_v59, %v1709_v3  ;;  %v566_v13 = vadd.f32 %v565_v41, %v1718_v11  ;;  %v1198_v29 = vpop.eup %1197 }
 0x1ca   :  { %1201 = vtanh.f32 %v618_v9  ;;  %v839_v59 = vmul.f32 %v1198_v29, %v1741_v50 }
 0x1cb   :  { %v594_v60 = vpop.f32.mrf.mxu1  ;;  %1203 = vtanh.f32 %v647_v12 }
 0x1cc   :  { %v595_v14 = vadd.f32 %v594_v60, %v1718_v11  ;;  %1205 = vtanh.f32 %v566_v13  ;;  %v1200_v33 = vpop.eup %1199  ;;  %v831_v60 = vmul.f32 %v1194_v22, %v1732_v39 }
 0x1cd   :  { %v840_v53 = vmul.f32 %v1200_v33, %v1741_v50 }
 0x1ce   :  { %1207 = vtanh.f32 %v595_v14 }
 0x1cf   :  { %v620_v0 = vpop.f32.mrf.mxu2 }
 0x1d0   :  { %v649_v61 = vpop.f32.mrf.mxu3  ;;  %v1707_v1 = vpop.f32.mrf.mxu0  ;;  %v621_v16 = vadd.f32 %v620_v0, %v1712_v63 }
 0x1d1   :  { %v650_v21 = vadd.f32 %v649_v61, %v1712_v63  ;;  %v1202_v37 = vpop.eup %1201  ;;  %v569_v55 = vadd.f32 %v1707_v1, %v1724_v20 }
 0x1d2   :  { %1209 = vtanh.f32 %v621_v16  ;;  %v1204_v28 = vpop.eup %1203  ;;  %v833_v6 = vmul.f32 %v1202_v37, %v1732_v39 }
 0x1d3   :  { %v597_v2 = vpop.f32.mrf.mxu1  ;;  %1211 = vtanh.f32 %v650_v21  ;;  %v1206_v43 = vpop.eup %1205  ;;  %v834_v7 = vmul.f32 %v1204_v28, %v1732_v39 }
 0x1d4   :  { %v598_v24 = vadd.f32 %v597_v2, %v1724_v20  ;;  %v1208_v19 = vpop.eup %1207  ;;  %v847_v16 = vmul.f32 %v1206_v43, %v1747_v30 }
 0x1d5   :  { %v848_v0 = vmul.f32 %v1208_v19, %v1747_v30 }
 0x1d6   :  { %1213 = vtanh.f32 %v598_v24 }
 0x1d7   :  { %v623_v4 = vpop.f32.mrf.mxu2 }
 0x1d8   :  { %v652_v62 = vpop.f32.mrf.mxu3  ;;  %v675_v5 = vpop.f32.mrf.mxu0  ;;  %v624_v27 = vadd.f32 %v623_v4, %v1718_v11 }
 0x1d9   :  { %v653_v31 = vadd.f32 %v652_v62, %v1718_v11  ;;  %v676_v34 = vadd.f32 %v675_v5, %v1709_v3  ;;  %v1210_v48 = vpop.eup %1209  ;;  %v1755_v62 = vpop.permute.xlu1 %828  ;;  %v872_v5 = vadd.f32 %v840_v53, %v832_v58 }
 0x1da   :  { %1215 = vtanh.f32 %v624_v27  ;;  %v1212_v25 = vpop.eup %1211  ;;  %v841_v61 = vmul.f32 %v1210_v48, %v1741_v50 }
 0x1db   :  { %1217 = vtanh.f32 %v653_v31  ;;  %v842_v2 = vmul.f32 %v1212_v25, %v1741_v50  ;;  %v873_v21 = vadd.f32 %v872_v5, %v848_v0 }
 0x1dc   :  { %v704_v10 = vpop.f32.mrf.mxu1  ;;  %1219 = vtanh.f32 %v676_v34  ;;  %v1214_v36 = vpop.eup %1213  ;;  %v881_v22 = vadd.f32 %v841_v61, %v833_v6 }
 0x1dd   :  { %v705_v38 = vadd.f32 %v704_v10, %v1709_v3  ;;  %v856_v10 = vmul.f32 %v1214_v36, %v1755_v62  ;;  %v890_v24 = vadd.f32 %v842_v2, %v834_v7 }
 0x1df   :  { %v626_v15 = vpop.f32.mrf.mxu2  ;;  %1221 = vtanh.f32 %v705_v38  ;;  %v874_v34 = vadd.f32 %v873_v21, %v856_v10 }
 0x1e0   :  { %v655_v17 = vpop.f32.mrf.mxu3  ;;  %v678_v18 = vpop.f32.mrf.mxu0  ;;  %v627_v40 = vadd.f32 %v626_v15, %v1724_v20  ;;  %v863_v15 = vadd.f32 %v839_v59, %v831_v60 }
 0x1e1   :  { %v656_v44 = vadd.f32 %v655_v17, %v1724_v20  ;;  %v679_v23 = vadd.f32 %v678_v18, %v1712_v63  ;;  %v1216_v52 = vpop.eup %1215 }
 0x1e2   :  { %1223 = vtanh.f32 %v627_v40  ;;  %v1218_v42 = vpop.eup %1217  ;;  %v849_v12 = vmul.f32 %v1216_v52, %v1747_v30 }
 0x1e3   :  { %1225 = vtanh.f32 %v656_v44  ;;  %v1220_v56 = vpop.eup %1219  ;;  %v850_v17 = vmul.f32 %v1218_v42, %v1747_v30  ;;  %v864_v42 = vadd.f32 %v863_v15, %v847_v16 }
 0x1e4   :  { %v707_v32 = vpop.f32.mrf.mxu1  ;;  %1227 = vtanh.f32 %v679_v23  ;;  %v882_v37 = vadd.f32 %v881_v22, %v849_v12  ;;  %v835_v44 = vmul.f32 %v1220_v56, %v1732_v39 }
 0x1e5   :  { %v708_v35 = vadd.f32 %v707_v32, %v1712_v63  ;;  %v1222_v41 = vpop.eup %1221  ;;  %v891_v43 = vadd.f32 %v890_v24, %v850_v17 }
 0x1e7   :  { %1229 = vtanh.f32 %v708_v35 }
 0x1e8   :  { %v733_v45 = vpop.f32.mrf.mxu2  ;;  %v1736_v46 = vpop.f32.mrf.mxu3 }
 0x1e9   :  { %v681_v47 = vpop.f32.mrf.mxu0  ;;  %v1224_v57 = vpop.eup %1223  ;;  %v734_v32 = vadd.f32 %v733_v45, %v1709_v3  ;;  %v763_v28 = vadd.f32 %v1736_v46, %v1709_v3  ;;  %v836_v45 = vmul.f32 %v1222_v41, %v1732_v39  ;;  %v875_v41 = vrot.slane %v874_v34, 4 }
 0x1ea   :  { %v682_v49 = vadd.f32 %v681_v47, %v1718_v11  ;;  %v1226_v9 = vpop.eup %1225  ;;  %v857_v26 = vmul.f32 %v1224_v57, %v1755_v62 }
 0x1eb   :  { %v1228_v14 = vpop.eup %1227  ;;  %v858_v31 = vmul.f32 %v1226_v9, %v1755_v62  ;;  %v876_v16 = vadd.f32 %v875_v41, %v874_v34 }
 0x1ec   :  { %v710_v51 = vpop.f32.mrf.mxu1  ;;  %1231 = vtanh.f32 %v682_v49  ;;  %v843_v38 = vmul.f32 %v1228_v14, %v1741_v50  ;;  %v883_v36 = vadd.f32 %v882_v37, %v857_v26 }
 0x1ed   :  { %v711_v54 = vadd.f32 %v710_v51, %v1718_v11  ;;  %v1230_v18 = vpop.eup %1229  ;;  %v892_v3 = vadd.f32 %v891_v43, %v858_v31 }
 0x1ee   :  { %v844_v47 = vmul.f32 %v1230_v18, %v1741_v50  ;;  %v899_v51 = vadd.f32 %v843_v38, %v835_v44  ;;  %v884_v60 = vrot.slane %v883_v36, 4 }
 0x1ef   :  { %1233 = vtanh.f32 %v711_v54  ;;  %v893_v0 = vrot.slane %v892_v3, 4 }
 0x1f0   :  { %v736_v4 = vpop.f32.mrf.mxu2  ;;  %v765_v1 = vpop.f32.mrf.mxu3  ;;  %1235 = vtanh.f32 %v569_v55  ;;  %v908_v56 = vadd.f32 %v844_v47, %v836_v45  ;;  %v885_v10 = vadd.f32 %v884_v60, %v883_v36 }
 0x1f1   :  { %v684_v8 = vpop.f32.mrf.mxu0  ;;  %v737_v19 = vadd.f32 %v736_v4, %v1712_v63  ;;  %v766_v35 = vadd.f32 %v765_v1, %v1712_v63  ;;  %v894_v12 = vadd.f32 %v893_v0, %v892_v3 }
 0x1f2   :  { %v685_v13 = vadd.f32 %v684_v8, %v1724_v20  ;;  %v1232_v29 = vpop.eup %1231 }
 0x1f3   :  { %v851_v48 = vmul.f32 %v1232_v29, %v1747_v30  ;;  %v886_v29 = vrot.slane %v885_v10, 2  ;;  %v895_v31 = vrot.slane %v894_v12, 2 }
 0x1f4   :  { %v713_v27 = vpop.f32.mrf.mxu1  ;;  %1237 = vtanh.f32 %v685_v13 }
 0x1f5   :  { %v714_v33 = vadd.f32 %v713_v27, %v1724_v20  ;;  %v1234_v40 = vpop.eup %1233  ;;  %v900_v63 = vadd.f32 %v899_v51, %v851_v48  ;;  %v896_v45 = vadd.f32 %v895_v31, %v894_v12 }
 0x1f6   :  { %v1236_v23 = vpop.eup %1235  ;;  %v852_v52 = vmul.f32 %v1234_v40, %v1747_v30 }
 0x1f7   :  { %1239 = vtanh.f32 %v714_v33  ;;  %v855_v55 = vmul.f32 %v1236_v23, %v1755_v62  ;;  %v877_v33 = vrot.slane %v876_v16, 2  ;;  %v887_v23 = vadd.f32 %v886_v29, %v885_v10 }
 0x1f8   :  { %v739_v25 = vpop.f32.mrf.mxu2  ;;  %v768_v49 = vpop.f32.mrf.mxu3  ;;  %1241 = vtanh.f32 %v734_v32  ;;  %v909_v61 = vadd.f32 %v908_v56, %v852_v52 }
 0x1f9   :  { %v740_v46 = vadd.f32 %v739_v25, %v1718_v11  ;;  %1243 = vtanh.f32 %v763_v28  ;;  %v769_v53 = vadd.f32 %v768_v49, %v1718_v11  ;;  %v865_v57 = vadd.f32 %v864_v42, %v855_v55  ;;  %v938_v42 = vpop.permute.xlu2 %937 }
 0x1fa   :  { %v1238_v54 = vpop.eup %1237  ;;  %1245 = vtanh.f32 %v737_v19  ;;  %v888_v52 = vrot.slane %v887_v23, 1 }
 0x1fb   :  { %1247 = vtanh.f32 %v766_v35  ;;  %v859_v58 = vmul.f32 %v1238_v54, %v1755_v62  ;;  %v866_v24 = vrot.slane %v865_v57, 4  ;;  %v878_v35 = vadd.f32 %v877_v33, %v876_v16 }
 0x1fc   :  { %1249 = vtanh.f32 %v740_v46  ;;  %v889_v0 = vadd.f32 %v888_v52, %v887_v23 }
 0x1fd   :  { %v1240_v59 = vpop.eup %1239  ;;  %v901_v2 = vadd.f32 %v900_v63, %v859_v58  ;;  %1251 = vtanh.f32 %v769_v53  ;;  %v867_v43 = vadd.f32 %v866_v24, %v865_v57  ;;  %v879_v55 = vrot.slane %v878_v35, 1 }
 0x1fe   :  { %v860_v4 = vmul.f32 %v1240_v59, %v1755_v62  ;;  %v1242_v11 = vpop.eup %1241 }
 0x1ff   :  { %v1244_v1 = vpop.eup %1243  ;;  %v902_v5 = vrot.slane %v901_v2, 4  ;;  %v837_v37 = vmul.f32 %v1242_v11, %v1732_v39  ;;  %v868_v46 = vrot.slane %v867_v43, 2 }
 0x200   :  { %v910_v6 = vadd.f32 %v909_v61, %v860_v4  ;;  %v742_v7 = vpop.f32.mrf.mxu2  ;;  %v771_v8 = vpop.f32.mrf.mxu3  ;;  %v838_v34 = vmul.f32 %v1244_v1, %v1732_v39 }
 0x201   :  { %v1246_v9 = vpop.eup %1245  ;;  %v743_v13 = vadd.f32 %v742_v7, %v1724_v20  ;;  %v772_v14 = vadd.f32 %v771_v8, %v1724_v20  ;;  %v903_v21 = vadd.f32 %v902_v5, %v901_v2  ;;  %v869_v59 = vadd.f32 %v868_v46, %v867_v43 }
 0x202   :  { %v1248_v15 = vpop.eup %1247  ;;  %v911_v17 = vrot.slane %v910_v6, 4  ;;  %v845_v26 = vmul.f32 %v1246_v9, %v1741_v50  ;;  %v940_v2 = vperm.slane %v938_v42, 0 }
 0x203   :  { %v1250_v18 = vpop.eup %1249  ;;  %1253 = vtanh.f32 %v743_v13  ;;  %v846_v32 = vmul.f32 %v1248_v15, %v1741_v50  ;;  %v904_v38 = vrot.slane %v903_v21, 2  ;;  %v870_v5 = vrot.slane %v869_v59, 1 }
 0x204   :  { %v1252_v22 = vpop.eup %1251  ;;  %v912_v27 = vadd.f32 %v911_v17, %v910_v6  ;;  %1255 = vtanh.f32 %v772_v14  ;;  %v853_v20 = vmul.f32 %v1250_v18, %v1747_v30  ;;  %v917_v44 = vadd.f32 %v845_v26, %v837_v37 }
 0x205   :  { %v854_v40 = vmul.f32 %v1252_v22, %v1747_v30  ;;  %v926_v47 = vadd.f32 %v846_v32, %v838_v34  ;;  %v905_v49 = vadd.f32 %v904_v38, %v903_v21  ;;  %v897_v30 = vrot.slane %v896_v45, 1 }
 0x206   :  { %v913_v28 = vrot.slane %v912_v27, 2  ;;  %v918_v50 = vadd.f32 %v917_v44, %v853_v20  ;;  %v943_v8 = vadd.f32 %v940_v2, %v889_v0  ;;  %v871_v16 = vadd.f32 %v870_v5, %v869_v59 }
 0x207   :  { %v927_v3 = vadd.f32 %v926_v47, %v854_v40  ;;  %v906_v56 = vrot.slane %v905_v49, 1  ;;  %v898_v61 = vadd.f32 %v897_v30, %v896_v45 }
 0x208   :  { %v914_v36 = vadd.f32 %v913_v28, %v912_v27  ;;  %v958_v21 = vrot.slane %v943_v8, 6  ;;  %v941_v32 = vadd.f32 %v940_v2, %v871_v16 }
 0x209   :  { %v1254_v19 = vpop.eup %1253  ;;  %v907_v1 = vadd.f32 %v906_v56, %v905_v49  ;;  %v944_v9 = vadd.f32 %v940_v2, %v898_v61 }
 0x20a   :  { %v1256_v48 = vpop.eup %1255  ;;  %v861_v25 = vmul.f32 %v1254_v19, %v1755_v62  ;;  %v915_v63 = vrot.slane %v914_v36, 1 }
 0x20b   :  { %v862_v39 = vmul.f32 %v1256_v48, %v1755_v62  ;;  %v880_v62 = vadd.f32 %v879_v55, %v878_v35  ;;  %v945_v14 = vadd.f32 %v940_v2, %v907_v1  ;;  %v959_v22 = vrot.slane %v944_v9, 5 }
 0x20c   :  { %v919_v51 = vadd.f32 %v918_v50, %v861_v25  ;;  %v916_v57 = vadd.f32 %v915_v63, %v914_v36 }
 0x20d   :  { %v928_v53 = vadd.f32 %v927_v3, %v862_v39  ;;  %v942_v13 = vadd.f32 %v940_v2, %v880_v62  ;;  %v960_v29 = vrot.slane %v945_v14, 4  ;;  %v967_v20 = vsel %vm966_vm2, %v958_v21, %v959_v22 }
 0x20e   :  { %v920_v54 = vrot.slane %v919_v51, 4  ;;  %v946_v15 = vadd.f32 %v940_v2, %v916_v57 }
 0x20f   :  { %v929_v58 = vrot.slane %v928_v53, 4  ;;  %v957_v27 = vrot.slane %v942_v13, 7 }
 0x210   :  { %v921_v41 = vadd.f32 %v920_v54, %v919_v51  ;;  %v961_v31 = vrot.slane %v946_v15, 3 }
 0x211   :  { %v930_v60 = vadd.f32 %v929_v58, %v928_v53  ;;  %v965_v34 = vsel %vm964_vm1, %v941_v32, %v957_v27 }
 0x212   :  { %v922_v4 = vrot.slane %v921_v41, 2  ;;  %v971_v38 = vsel %vm970_vm3, %v960_v29, %v961_v31  ;;  %v969_v40 = vsel %vm968_vm5, %v965_v34, %v967_v20 }
 0x213   :  { %v931_v11 = vrot.slane %v930_v60, 2 }
 0x214   :  { %v923_v6 = vadd.f32 %v922_v4, %v921_v41 }
 0x215   :  { %v932_v7 = vadd.f32 %v931_v11, %v930_v60 }
 0x216   :  { %v924_v10 = vrot.slane %v923_v6, 1 }
 0x217   :  { %v933_v12 = vrot.slane %v932_v7, 1 }
 0x218   :  { %v925_v17 = vadd.f32 %v924_v10, %v923_v6 }
 0x219   :  { %v934_v18 = vadd.f32 %v933_v12, %v932_v7 }
 0x21a   :  { %v947_v24 = vadd.f32 %v940_v2, %v925_v17 }
 0x21b   :  { %v948_v26 = vadd.f32 %v940_v2, %v934_v18 }
 0x21c   :  { %v962_v33 = vrot.slane %v947_v24, 2 }
 0x21d   :  { %v963_v37 = vrot.slane %v948_v26, 1 }
 0x21f   :  { %v973_v28 = vsel %vm972_vm4, %v962_v33, %v963_v37 }
 0x220   :  { %v975_v43 = vsel %vm974_vm6, %v971_v38, %v973_v28 }
 0x221   :  { %v977_v44 = vsel %vm976_vm7, %v969_v40, %v975_v43 }
 0x222   :  { %979 = vst [vmem:[#allocation3] sm:$0xff] %v977_v44 }
 0x223   :  { %990 = dma.vmem_to_hbm [thread:$0]  %s986_s16, 128, %s988_s17, [#allocation4]  }
 0x224   :  { %1281 = dma.done.wait [#allocation4], 128  }
 0x225   :  { %1282 = vsyncadd [#allocation4], 4294967168 }
 0x226   :  { %995 = vsyncpa [#allocation4], 1 }

</bundles_post_ra>
